<compile_context>
chip_gen: v6e
topology: v6e:2x2x1
jax: 0.10.0
libtpu: 0.0.40
codegen_flags: <defaults>
</compile_context>

<pallas_src>
import jax
import jax.numpy as jnp
from jax import lax
from jax.experimental import pallas as pl
from jax.experimental.pallas import tpu as pltpu


def _ceil_to(v, m):
    return ((v + m - 1) // m) * m


def _vmem_limit_bytes():
    """Generation-aware scoped-VMEM limit (v5e/v6e: 128 MiB phys, v7x: 64 MiB)."""
    try:
        cap = int(pltpu.get_tpu_info().vmem_capacity_bytes)
    except Exception:
        cap = 64 * 1024 * 1024
    return max(32 * 1024 * 1024, min((cap * 3) // 4, 96 * 1024 * 1024))


def _row_tile(n, adj_itemsize, block):
    """Row tile: <= block, split >=2 ways when the graph allows (v7x has 2 TCs)."""
    align = 32 if adj_itemsize == 1 else 8     # int8 packs 4 rows per sublane word
    return min(_ceil_to(block, align),
               _ceil_to(max((n + 1) // 2, align), align))


def _pad_rows(n, tm):
    n_rows = _ceil_to(n, tm)
    if n_rows // tm < 2:
        n_rows += tm          # force a 2nd (inert, zero) row block -> both v7x TCs busy
    return n_rows


def _main_tiles(n, f_in_pad, f_out_pad, adj_isz, x_isz, w_isz, block, budget):
    row_align = 32 if adj_isz == 1 else 8
    tm = _row_tile(n, adj_isz, block)
    tk = min(_ceil_to(n, 128), _ceil_to(2 * block, 128))   # up to 2K-wide k tile

    def vmem_bytes(tm_, tk_):
        return (2 * tm_ * tk_ * adj_isz              # A tile, double-buffered
                + 2 * tk_ * f_in_pad * x_isz         # Xs tile, double-buffered
                + 2 * f_in_pad * f_out_pad * w_isz   # resident W (still 2x-buffered)
                + 2 * f_out_pad * 4                  # resident bias (f32)
                + 2 * tm_ * 4                        # d_i tile
                + tm_ * f_in_pad * 4                 # f32 accumulator scratch
                + 2 * tm_ * f_out_pad * 4)           # out tile, double-buffered

    while tk > 128 and vmem_bytes(tm, tk) > budget:
        tk = _ceil_to(tk // 2, 128)
    while tm > row_align and vmem_bytes(tm, tk) > budget:
        tm = _ceil_to(tm // 2, row_align)

    return tm, _pad_rows(n, tm), tk, _ceil_to(n, tk)


def _degree_tiles(n, adj_isz, block, budget):
    tm = _row_tile(n, adj_isz, block)
    # Degree pass only holds the A tile + a (tm,128) accumulator -> very wide k tile.
    tk = min(_ceil_to(n, 128), 4096)

    def vmem_bytes(tm_, tk_):
        return 2 * tm_ * tk_ * adj_isz + tm_ * 128 * 4 + 2 * tm_ * 4

    while tk > 128 and vmem_bytes(tm, tk) > budget:
        tk = _ceil_to(tk // 2, 128)

    return tm, _pad_rows(n, tm), tk, _ceil_to(n, tk)


def _degree_kernel(adj_ref, d_ref, acc_ref):
    """acc(tm,128) += A_blk @ ones (lane-dense, MXU); finalize: d = rsqrt(rowsum)."""

    @pl.when(pl.program_id(1) == 0)
    def _init():
        acc_ref[...] = jnp.zeros_like(acc_ref)

    adj_blk = adj_ref[...]
    if jnp.issubdtype(adj_blk.dtype, jnp.integer):
        adj_blk = adj_blk.astype(jnp.bfloat16)       # int8 A in HBM -> bf16 for the MXU
    ones = jnp.ones((adj_blk.shape[1], 128), adj_blk.dtype)
    # Rowsum on the (otherwise idle) MXU; every lane of the product holds the same
    # partial rowsum, so the accumulator add stays a full-vreg op.
    acc_ref[...] += jnp.dot(adj_blk, ones, preferred_element_type=jnp.float32)

    @pl.when(pl.program_id(1) == pl.num_programs(1) - 1)
    def _finalize():
        rowsum = acc_ref[:, 0:1]                     # lane-slice once, not per step
        d = lax.rsqrt(rowsum)                        # single EUP op
        d_ref[...] = jnp.where(rowsum > 0.0, d, 0.0)  # isolated / padded rows -> 0


def _gcn_kernel(d_i_ref, adj_ref, xs_ref, w_ref, b_ref, out_ref, acc_ref):
    """acc += A[i,k] @ Xs[k];  last k:  out = relu( d[i] * acc @ W^T + b )."""

    @pl.when(pl.program_id(1) == 0)
    def _init():
        acc_ref[...] = jnp.zeros_like(acc_ref)

    adj_blk = adj_ref[...]
    if jnp.issubdtype(adj_blk.dtype, jnp.integer):
        adj_blk = adj_blk.astype(xs_ref.dtype)       # int8 A in HBM -> matmul dtype
    # Pure MXU inner loop: X was already scaled by diag(d) once in the wrapper.
    acc_ref[...] += jnp.dot(adj_blk, xs_ref[...], preferred_element_type=jnp.float32)

    @pl.when(pl.program_id(1) == pl.num_programs(1) - 1)
    def _epilogue():
        support = (d_i_ref[...] * acc_ref[...]).astype(w_ref.dtype)   # (tm, f_in_pad)
        out = jnp.dot(support, w_ref[...],                            # pre-transposed W
                      preferred_element_type=jnp.float32)             # (tm, f_out_pad)
        out = out + b_ref[...]
        out_ref[...] = jnp.maximum(out, 0.0).astype(out_ref.dtype)


def compute_d_inv_sqrt(adj, *, block=1024, vmem_limit=None):
    """d = rsqrt(rowsum(A)), with rowsum==0 guarded to 0.  Returns (N,) f32.

    Cache this per adjacency (GCN reuses the same A every layer/epoch) and pass it
    to gcn_layer(..., d_inv_sqrt=d) so A is not re-streamed by the degree pass.
    """
    n = adj.shape[0]
    vmem_limit = _vmem_limit_bytes() if vmem_limit is None else vmem_limit
    isz = jnp.dtype(adj.dtype).itemsize
    tm, n_rows, tk, n_cols = _degree_tiles(n, isz, block, int(vmem_limit * 0.8))

    adj_p = jnp.pad(adj, ((0, n_rows - n), (0, n_cols - n)))

    d_p = pl.pallas_call(
        _degree_kernel,
        out_shape=jax.ShapeDtypeStruct((n_rows, 1), jnp.float32),
        grid=(n_rows // tm, n_cols // tk),
        in_specs=[pl.BlockSpec((tm, tk), lambda i, k: (i, k))],
        out_specs=pl.BlockSpec((tm, 1), lambda i, k: (i, 0)),
        scratch_shapes=[pltpu.VMEM((tm, 128), jnp.float32)],
        compiler_params=pltpu.CompilerParams(
            dimension_semantics=("parallel", "arbitrary"),
            vmem_limit_bytes=vmem_limit),
    )(adj_p)
    return d_p[:n, 0]


def gcn_layer(x, adj, weight, bias, *, d_inv_sqrt=None, block=1024):
    """ReLU( D^-1/2 A D^-1/2 X W^T + b ).

    x: (N, F_in), adj: (N, N) (f32/bf16, or int8 for unweighted graphs),
    weight: (F_out, F_in), bias: (F_out,), d_inv_sqrt: optional cached (N,) scales.
    Returns (N, F_out) f32.
    """
    n, f_in = x.shape
    f_out = weight.shape[0]
    vmem_limit = _vmem_limit_bytes()

    if d_inv_sqrt is None:
        d_inv_sqrt = compute_d_inv_sqrt(adj, block=block, vmem_limit=vmem_limit)
    d = d_inv_sqrt.astype(jnp.float32).reshape(n, 1)

    # Lane-dense padding of feature axes (multiples of 128) -> unmasked output stores.
    f_in_pad = _ceil_to(f_in, 128)
    f_out_pad = _ceil_to(f_out, 128)

    adj_isz = jnp.dtype(adj.dtype).itemsize
    tm, n_rows, tk, n_cols = _main_tiles(
        n, f_in_pad, f_out_pad, adj_isz, jnp.dtype(x.dtype).itemsize,
        jnp.dtype(weight.dtype).itemsize, block, int(vmem_limit * 0.8))

    # Zero padding is semantically inert: padded rows/cols of A are zero, padded rows
    # of Xs are zero, padded feature/output columns of W/b are zero; padded output
    # rows/cols are sliced off below.  (Production: pad/quantize A and pad/transpose
    # W, b once at init rather than per call.)
    adj_p = jnp.pad(adj, ((0, n_rows - n), (0, n_cols - n)))

    # diag(d) @ X done ONCE per layer in f32 (not per row-block inside the kernel),
    # then dropped to the matmul dtype a single time.
    xs = (d * x.astype(jnp.float32)).astype(x.dtype)
    xs_p = jnp.pad(xs, ((0, n_cols - n), (0, f_in_pad - f_in)))

    d_row_p = jnp.pad(d, ((0, n_rows - n), (0, 0)))

    # Pre-transposed, padded weight -> canonical (m,k)@(k,n) epilogue contraction.
    w_t = jnp.pad(weight, ((0, f_out_pad - f_out), (0, f_in_pad - f_in))).T
    b_p = jnp.pad(bias.astype(jnp.float32).reshape(1, f_out),
                  ((0, 0), (0, f_out_pad - f_out)))

    # TODO(synk): on v7x with large F_in/F_out, single-buffer the loop-invariant W/b
    # blocks (pipeline_mode=pl.Buffered(1)) to free VMEM for bigger A/Xs tiles.
    out_p = pl.pallas_call(
        _gcn_kernel,
        out_shape=jax.ShapeDtypeStruct((n_rows, f_out_pad), jnp.float32),
        grid=(n_rows // tm, n_cols // tk),
        in_specs=[
            pl.BlockSpec((tm, 1), lambda i, k: (i, 0)),                 # d for row block
            pl.BlockSpec((tm, tk), lambda i, k: (i, k)),                # A tile
            pl.BlockSpec((tk, f_in_pad), lambda i, k: (k, 0)),          # pre-scaled X
            pl.BlockSpec((f_in_pad, f_out_pad), lambda i, k: (0, 0)),   # W^T (resident)
            pl.BlockSpec((1, f_out_pad), lambda i, k: (0, 0)),          # b   (resident)
        ],
        out_specs=pl.BlockSpec((tm, f_out_pad), lambda i, k: (i, 0)),
        scratch_shapes=[pltpu.VMEM((tm, f_in_pad), jnp.float32)],
        compiler_params=pltpu.CompilerParams(
            dimension_semantics=("parallel", "arbitrary"),
            vmem_limit_bytes=vmem_limit),
    )(d_row_p, adj_p, xs_p, w_t, b_p)

    return out_p[:n, :f_out]


def gcn_reference(x, adj, weight, bias):
    """Pure-JAX reference mirroring the PyTorch forward."""
    rowsum = adj.sum(1)
    d_inv_sqrt = jnp.power(rowsum, -0.5)
    d_inv_sqrt = jnp.where(jnp.isinf(d_inv_sqrt), 0.0, d_inv_sqrt)
    d_mat = jnp.diag(d_inv_sqrt)
    norm_adj = d_mat @ adj @ d_mat
    support = norm_adj @ x
    return jax.nn.relu(support @ weight.T + bias)


if __name__ == "__main__":
    key = jax.random.PRNGKey(0)
    k_adj, k_x, k_w, k_b = jax.random.split(key, 4)

    N, F_IN, F_OUT = 8, 32, 16

    # Symmetric binary adjacency with self-loops; node 3 made isolated to exercise
    # the rowsum == 0 guard.  Stored as int8 in HBM (exact for 0/1/2 entries); the
    # kernels cast tiles to bf16 right before the MXU dot.
    a = (jax.random.uniform(k_adj, (N, N)) > 0.5).astype(jnp.float32)
    adj_f32 = jnp.maximum(a, a.T) + jnp.eye(N, dtype=jnp.float32)
    adj_f32 = adj_f32.at[3, :].set(0.0)
    adj_f32 = adj_f32.at[:, 3].set(0.0)
    adj_i8 = adj_f32.astype(jnp.int8)

    x = jax.random.normal(k_x, (N, F_IN), dtype=jnp.float32)
    bound = 1.0 / (F_IN ** 0.5)   # nn.Linear-style init
    weight = jax.random.uniform(k_w, (F_OUT, F_IN), minval=-bound, maxval=bound,
                                dtype=jnp.float32)
    bias = jax.random.uniform(k_b, (F_OUT,), minval=-bound, maxval=bound,
                              dtype=jnp.float32)

    # bf16 matmul operands (adjacency entries are small integers -> exact); f32
    # accumulation inside the kernel.
    x_bf = x.astype(jnp.bfloat16)
    w_bf = weight.astype(jnp.bfloat16)

    # Degree pass once per adjacency (cache d across layers/epochs), then the fused
    # main pass with the cached d -> A is streamed only once per layer here.
    d = jax.block_until_ready(jax.jit(compute_d_inv_sqrt)(adj_i8))
    gcn = jax.jit(gcn_layer)
    out = jax.block_until_ready(gcn(x_bf, adj_i8, w_bf, bias, d_inv_sqrt=d))

    # Reference in f32 on the same rounded inputs.
    ref = gcn_reference(x_bf.astype(jnp.float32), adj_f32,
                        w_bf.astype(jnp.float32), bias)

    assert out.shape == (N, F_OUT)
    assert out.dtype == jnp.float32
    assert jnp.allclose(out, ref, atol=2e-2, rtol=2e-2), "mismatch vs reference"
    print("KERNEL_OK")
</pallas_src>

<mosaic_0001>
module attributes {stable_mosaic.version = 11 : i64} {
  func.func @_degree_kernel(%arg0: i32, %arg1: i32, %arg2: memref<32x128xi8, #tpu.memory_space<vmem>>, %arg3: memref<32x1xf32, #tpu.memory_space<vmem>>, %arg4: memref<32x128xf32, #tpu.memory_space<vmem>>) attributes {dimension_semantics = [#tpu.dimension_semantics<parallel>, #tpu.dimension_semantics<arbitrary>], iteration_bounds = array<i64: 2, 1>, scalar_prefetch = 0 : i64, scratch_operands = 1 : i64, tpu.core_type = #tpu.core_type<tc>, window_params = [{transform_indices = @transform_0, window_bounds = array<i64: 32, 128>}, {transform_indices = @transform_1, window_bounds = array<i64: 32, 1>}]} {
    %c0_i32 = arith.constant 0 : i32
    %0 = arith.cmpi eq, %arg1, %c0_i32 : i32
    %1 = arith.extui %0 : i1 to i32
    %c0_i32_0 = arith.constant 0 : i32
    %2 = arith.cmpi ne, %1, %c0_i32_0 : i32
    scf.if %2 {
      %cst_9 = arith.constant 0.000000e+00 : f32
      %13 = vector.broadcast %cst_9 : f32 to vector<32x128xf32>
      %c0_10 = arith.constant 0 : index
      %c0_11 = arith.constant 0 : index
      %14 = vector.load %arg4[%c0_10, %c0_11] : memref<32x128xf32, #tpu.memory_space<vmem>>, vector<32x128xf32>
      tpu.vector_store %arg4[%c0_10, %c0_11], %13 {strides = array<i32>} : memref<32x128xf32, #tpu.memory_space<vmem>>, vector<32x128xf32>,
    } else {
    }
    %c0 = arith.constant 0 : index
    %c0_1 = arith.constant 0 : index
    %3 = vector.load %arg2[%c0, %c0_1] : memref<32x128xi8, #tpu.memory_space<vmem>>, vector<32x128xi8>
    %4 = arith.sitofp %3 : vector<32x128xi8> to vector<32x128xbf16>
    %cst = arith.constant 1.000000e+00 : bf16
    %5 = vector.broadcast %cst : bf16 to vector<128x128xbf16>
    %c0_2 = arith.constant 0 : index
    %c0_3 = arith.constant 0 : index
    %6 = vector.load %arg4[%c0_2, %c0_3] : memref<32x128xf32, #tpu.memory_space<vmem>>, vector<32x128xf32>
    %cst_4 = arith.constant dense<0.000000e+00> : vector<32x128xf32>
    %7 = tpu.matmul %4, %5, %cst_4 {dimension_numbers = #tpu.dot_dimension_numbers<[1], [0], [0], [1], [0, 0, 1, 1], [], []>} : vector<32x128xbf16>, vector<128x128xbf16>, vector<32x128xf32> -> vector<32x128xf32>
    %8 = arith.addf %6, %7 : vector<32x128xf32>
    %c0_5 = arith.constant 0 : index
    %c0_6 = arith.constant 0 : index
    %9 = vector.load %arg4[%c0_5, %c0_6] : memref<32x128xf32, #tpu.memory_space<vmem>>, vector<32x128xf32>
    tpu.vector_store %arg4[%c0_5, %c0_6], %8 {strides = array<i32>} : memref<32x128xf32, #tpu.memory_space<vmem>>, vector<32x128xf32>,
    %c0_i32_7 = arith.constant 0 : i32
    %10 = arith.cmpi eq, %arg1, %c0_i32_7 : i32
    %11 = arith.extui %10 : i1 to i32
    %c0_i32_8 = arith.constant 0 : i32
    %12 = arith.cmpi ne, %11, %c0_i32_8 : i32
    scf.if %12 {
      %c0_9 = arith.constant 0 : index
      %c0_10 = arith.constant 0 : index
      %13 = vector.load %arg4[%c0_9, %c0_10] : memref<32x128xf32, #tpu.memory_space<vmem>>, vector<32x1xf32>
      %14 = math.rsqrt %13 : vector<32x1xf32>
      %cst_11 = arith.constant 0.000000e+00 : f32
      %15 = vector.broadcast %cst_11 : f32 to vector<32x1xf32>
      %16 = arith.cmpf ogt, %13, %15 : vector<32x1xf32>
      %cst_12 = arith.constant 0.000000e+00 : f32
      %17 = vector.broadcast %cst_12 : f32 to vector<32x1xf32>
      %18 = arith.select %16, %14, %17 : vector<32x1xi1>, vector<32x1xf32>
      %c0_13 = arith.constant 0 : index
      %c0_14 = arith.constant 0 : index
      %19 = vector.load %arg3[%c0_13, %c0_14] : memref<32x1xf32, #tpu.memory_space<vmem>>, vector<32x1xf32>
      tpu.vector_store %arg3[%c0_13, %c0_14], %18 {strides = array<i32>} : memref<32x1xf32, #tpu.memory_space<vmem>>, vector<32x1xf32>,
    } else {
    }
    return
  }
  func.func @transform_0(%arg0: i32, %arg1: i32) -> (i32, i32) {
    %c0_i32 = arith.constant 0 : i32
    return %arg0, %arg1 : i32, i32
  }
  func.func @transform_1(%arg0: i32, %arg1: i32) -> (i32, i32) {
    %c0_i32 = arith.constant 0 : i32
    %c0_i32_0 = arith.constant 0 : i32
    return %arg0, %c0_i32 : i32, i32
  }
}

</mosaic_0001>

<bundles_post_ra>
// kernel: compute_d_inv_sqrt.1
= control target key start
LH: loop header
LB: loop body
LE: loop exit
PB: predicated region body
PF: predicated region fallthrough
CT: control target
= control target key end

     0   :  { %s412_s6 = smov 0   ;;  %s414_s7 = smov 0   ;;  %s454_s0 = inlined_call_operand.vmem [shape: s8[64,128], index: 0, kind: input, shape index: {}]   ;;  %s455_s1 = inlined_call_operand.vmem [shape: f32[64,1], index: 1, kind: output, shape index: {}]  }
   0x1   :  { %s416_s8 = smov 0  }
   0x2 LB: > { %s23_s9 = sadd.s32 1, %s395_s7  ;;  %p308_p0 = scmp.ge.s32.totalorder %s399_s8, 1  ;;  %s399_s8 = sphi %s416_s8, %s11_s8   ;;  %s395_s7 = sphi %s414_s7, %s457_s7   ;;  %s391_s6 = sphi %s412_s6, %s456_s6  }
   0x3   : > { %p25_p1 = scmp.ge.s32.totalorder %s23_s9, 2  ;;  %p103_p2 = scmp.lt.s32.totalorder %s399_s8, 3 }
   0x5   : > { %s459_s9 = smov (%p25_p1, %s23_s9), 0  ;;  %p104_p3 = pnand %p308_p0, %p103_p2 }
   0x6   : > { %p125_p4 = scmp.lt.s32.totalorder (!%p104_p3), %s391_s6, 1  ;;  %s310_s15 = sshll.u32 (!%p104_p3), %s391_s6, 2 }
   0x7   : > { %107 = sbr.rel (%p104_p3) target bundleno = 260 (0x104), region = 24  ;;  %p133_p5 = scmp.lt.s32.totalorder (!%p104_p3), %s310_s15, 7 }
   0xc   : > { %v401_v0 = vmov 1065369472   ;;  %s126_s10 = scalar_select %p125_p4, %s391_s6, 1  ;;  %vm231_vm0 = vcmask 7168  }
   0xd   : > { %324 = vmatprep.subr.bf16.mxu0 %v401_v0  ;;  %s461_s15 = smov (!%p133_p5, %s310_s15), 7 }
   0xe   : > { %325 = vmatpush3.bf16.msra.mxu0 %v401_v0  ;;  %s309_s11 = sshll.u32 %s126_s10, 3  ;;  %s311_s16 = sshll.u32 %s461_s15, 3 }
   0xf   : > { %326 = vmatprep.subr.bf16.mxu0 %v401_v0  ;;  %s131_s14 = scalar_lea.vmem %s454_s0, %s309_s11  ;;  %s136_s19 = scalar_lea.vmem %s455_s1, %s311_s16 }
  0x10   : > { %v148_v1 = vld [vmem:[%s131_s14] sm:$0xff] }
  0x11   : > { %v149_v2 = vunpack.c.l.s8.bf16 %v148_v1  ;;  %v150_v3 = vunpack.c.h.s8.bf16 %v148_v1 }
  0x12   : > { %327 = vmatpush3.bf16.msra.mxu0 %v401_v0 }
  0x13   : > { %328 = vmatprep.subr.bf16.mxu0 %v401_v0  ;;  %340 = vmatprep.mubr.bf16.mxu0 %v149_v2 }
  0x16   : > { %329 = vmatpush3.bf16.msra.mxu0 %v401_v0 }
  0x17   : > { %330 = vmatprep.subr.bf16.mxu0 %v401_v0 }
  0x1a   : > { %331 = vmatpush3.bf16.msra.mxu0 %v401_v0 }
  0x1b   : > { %332 = vmatprep.subr.bf16.mxu0 %v401_v0 }
  0x1e   : > { %333 = vmatpush3.bf16.msra.mxu0 %v401_v0 }
  0x1f   : > { %334 = vmatprep.subr.bf16.mxu0 %v401_v0 }
  0x22   : > { %335 = vmatpush3.bf16.msra.mxu0 %v401_v0 }
  0x23   : > { %336 = vmatprep.subr.bf16.mxu0 %v401_v0 }
  0x26   : > { %337 = vmatpush3.bf16.msra.mxu0 %v401_v0 }
  0x27   : > { %338 = vmatprep.subr.bf16.mxu0 %v401_v0 }
  0x2a   : > { %339 = vmatpush3.bf16.msra.mxu0 %v401_v0 }
  0x2d   : > { %341 = vmatmul.mubr.bf16.vlgmr.msra.gmra.mxu0 %v150_v3 }
  0xed   : > { %v342_v4 = vpop.f32.mrf.mxu0 }
  0xee   : > { %vm225_vm3 = vcmp.gt.f32.partialorder %v342_v4, 0.0 }
  0xef   : > { %v189_v5 = vpop.f32.mrf.mxu0 }
  0xf0   : > { %369 = vrsqrt.f32 %v189_v5  ;;  %vm223_vm1 = vcmp.gt.f32.partialorder %v189_v5, 0.0 }
  0xf1   : > { %v343_v6 = vpop.f32.mrf.mxu0  ;;  %371 = vrsqrt.f32 %v342_v4 }
  0xf2   : > { %373 = vrsqrt.f32 %v343_v6  ;;  %vm226_vm4 = vcmp.gt.f32.partialorder %v343_v6, 0.0 }
  0xf3   : > { %v192_v7 = vpop.f32.mrf.mxu0 }
  0xf4   : > { %375 = vrsqrt.f32 %v192_v7  ;;  %vm224_vm2 = vcmp.gt.f32.partialorder %v192_v7, 0.0 }
  0xfd   : > { %v370_v8 = vpop.eup %369 }
  0xfe   : > { %v227_v9 = vsel %vm223_vm1, %v370_v8, 0.0  ;;  %v372_v10 = vpop.eup %371 }
  0xff   : > { %232 = vst.msk [vmem:[%s136_s19] sm:$0xff] %vm231_vm0, %v227_v9  ;;  %v374_v11 = vpop.eup %373  ;;  %v229_v14 = vsel %vm225_vm3, %v372_v10, 0.0 }
 0x100   : > { %v230_v15 = vsel %vm226_vm4, %v374_v11, 0.0  ;;  %234 = vst.msk [vmem:[%s136_s19 + $0x10] sm:$0xff] %vm231_vm0, %v229_v14 }
 0x101   : > { %v376_v12 = vpop.eup %375  ;;  %235 = vst.msk [vmem:[%s136_s19 + $0x18] sm:$0xff] %vm231_vm0, %v230_v15 }
 0x102   : > { %v228_v13 = vsel %vm224_vm2, %v376_v12, 0.0 }
 0x103   : > { %233 = vst.msk [vmem:[%s136_s19 + $0x8] sm:$0xff] %vm231_vm0, %v228_v13 }
 0x104 PF: > { %s11_s8 = sadd.s32 1, %s399_s8   ;;  %s456_s6 = smov %s395_s7 }
 0x105   : > { %p8_p6 = scmp.ge.s32.totalorder %s11_s8, 4   ;;  %s457_s7 = smov %s459_s9 }
 0x107   :  { %10 = sbr.rel (!%p8_p6) target bundleno = 2 (0x2), region = 62 }

</bundles_post_ra>
